<compile_context>
chip_gen: v6e
topology: v6e:2x2x1
jax: 0.10.0
libtpu: 0.0.40
codegen_flags: <defaults>
</compile_context>

<pallas_src>
import functools

import jax
import jax.numpy as jnp
from jax.experimental import pallas as pl
from jax.experimental.pallas import tpu as pltpu


def _round_up(x, m):
    return (x + m - 1) // m * m


def _pad_dim(d):
    p128 = _round_up(d, 128)
    # Prefer 256-aligned K/N (full v6e/v7x MXU tiles) once the dim is large
    # enough that the extra <=128 lanes are cheap.
    return _round_up(d, 256) if p128 >= 1024 else p128


# ----------------------------------------------------------------------------
# Fused kernel
# ----------------------------------------------------------------------------
def _make_fused_mlp_kernel(num_layers, out_channels, matmul_dtype):
    """Returns kernel(x_ref, w0, b0, ..., w_{L-1}, b_{L-1}, o_ref)."""

    def kernel(*refs):
        x_ref = refs[0]
        o_ref = refs[-1]
        wb = refs[1:-1]

        # x is already in the matmul dtype (cast once in the wrapper).
        h = x_ref[...]

        # Hidden layers: Linear (BN folded into W/b) + ReLU.  Dropout is
        # identity in eval mode.  Weights arrive pre-cast; only the activation
        # needs a per-layer cast when running the bf16 MXU path.
        for i in range(num_layers - 1):
            w = wb[2 * i][...]
            b = wb[2 * i + 1][...]                       # f32 bias
            y = jnp.dot(h, w, preferred_element_type=jnp.float32)
            h = jnp.maximum(y + b, 0.0).astype(matmul_dtype)

        # Final layer + masked, max-stabilized log_softmax over valid lanes.
        y = jnp.dot(h, wb[-2][...], preferred_element_type=jnp.float32)
        y = y + wb[-1][...]
        col = jax.lax.broadcasted_iota(jnp.int32, y.shape, 1)
        y = jnp.where(col < out_channels, y, jnp.float32(-1e30))
        m = jnp.max(y, axis=-1, keepdims=True)
        z = y - m
        lse = jnp.log(jnp.sum(jnp.exp(z), axis=-1, keepdims=True))
        o_ref[...] = (z - lse).astype(o_ref.dtype)

    return kernel


# ----------------------------------------------------------------------------
# One-time parameter preparation (hoisted out of the per-call path)
# ----------------------------------------------------------------------------
def prepare_mlp_params(params, *, matmul_dtype=jnp.bfloat16, eps=1e-5):
    """Fold BatchNorm into the weights, zero-pad to TPU-friendly shapes and
    cast weights to the matmul dtype.  Run ONCE and cache the result; the
    returned arrays feed straight into the Pallas kernel on every forward."""
    num_layers = len(params["fcs"])
    in_channels = params["fcs"][0][0].shape[0]
    out_channels = params["fcs"][-1][0].shape[1]

    folded = []
    for i in range(num_layers - 1):
        w, b = params["fcs"][i]
        gamma, beta, mean, var = params["bns"][i]
        scale = gamma / jnp.sqrt(var + eps)              # (1, F_out)
        shift = beta - mean * scale                      # (1, F_out)
        folded.append((w * scale, b.reshape(1, -1) * scale + shift))
    w_last, b_last = params["fcs"][-1]
    folded.append((w_last, b_last.reshape(1, -1)))

    dims = [in_channels] + [w.shape[1] for w, _ in folded]
    dims_p = tuple(_pad_dim(d) for d in dims)

    # TODO(synk): optional fp8 weight storage (per-channel scale folded into
    # the bias) for the v7x MXU would further quarter resident VMEM vs f32.
    wb = []
    for i, (w, b) in enumerate(folded):
        fi, fo = w.shape
        w_p = jnp.zeros((dims_p[i], dims_p[i + 1]), jnp.float32).at[:fi, :fo].set(w)
        b_p = jnp.zeros((1, dims_p[i + 1]), jnp.float32).at[:, :fo].set(b)
        wb.append(w_p.astype(matmul_dtype))   # wrapper-side cast (halves DMA/VMEM)
        wb.append(b_p)                        # biases stay f32 (tiny; precise add)

    meta = dict(
        num_layers=num_layers,
        in_channels=in_channels,
        out_channels=out_channels,
        dims_p=dims_p,
        matmul_dtype=jnp.dtype(matmul_dtype),
    )
    return wb, meta


# ----------------------------------------------------------------------------
# Forward builder: BlockSpecs, VMEM budget, pallas_call
# ----------------------------------------------------------------------------
def make_mlp_forward(meta, *, tile_n=None, single_buffer_weights=True):
    num_layers = meta["num_layers"]
    in_channels = meta["in_channels"]
    out_channels = meta["out_channels"]
    dims_p = meta["dims_p"]
    matmul_dtype = meta["matmul_dtype"]
    wsize = jnp.dtype(matmul_dtype).itemsize

    kernel = _make_fused_mlp_kernel(num_layers, out_channels, matmul_dtype)
    weight_mode = pl.Buffered(1) if single_buffer_weights else None

    def forward(x, wb):
        n = x.shape[0]
        n8 = _round_up(n, 8)

        # Row tile: default 256 (multiple of 256); shrink so the batch grid has
        # >= 2 steps when the batch permits, so v7x's two TensorCores both get
        # work through dimension_semantics=("parallel",).
        tn = 256 if tile_n is None else tile_n
        tn = min(tn, n8)
        if n8 >= 16 and pl.cdiv(n8, tn) < 2:
            tn = max(8, _round_up(pl.cdiv(n8, 2), 8))
        n_pad = _round_up(n8, tn)
        grid = n_pad // tn

        x_p = jnp.zeros((n_pad, dims_p[0]), matmul_dtype)
        x_p = x_p.at[:n, :in_channels].set(x.astype(matmul_dtype))

        # ---- block specs: x/out tiled over batch; weights VMEM-resident with
        #      constant index_map (DMA'd once), single-buffered to halve their
        #      VMEM reservation. ----
        in_specs = [pl.BlockSpec((tn, dims_p[0]), lambda i: (i, 0))]
        for li in range(num_layers):
            w_shape = (dims_p[li], dims_p[li + 1])
            b_shape = (1, dims_p[li + 1])
            if weight_mode is not None:
                in_specs.append(
                    pl.BlockSpec(w_shape, lambda i: (0, 0), pipeline_mode=weight_mode))
                in_specs.append(
                    pl.BlockSpec(b_shape, lambda i: (0, 0), pipeline_mode=weight_mode))
            else:
                in_specs.append(pl.BlockSpec(w_shape, lambda i: (0, 0)))
                in_specs.append(pl.BlockSpec(b_shape, lambda i: (0, 0)))
        out_spec = pl.BlockSpec((tn, dims_p[-1]), lambda i: (i, 0))

        # ---- VMEM budget: resident weights (x1 or x2 buffers) + double-buffered
        #      I/O tiles + live intermediate activations (y f32, relu f32, plus
        #      the bf16 cast copy when applicable). ----
        w_buf = 1 if single_buffer_weights else 2
        w_bytes = (wsize * sum(dims_p[i] * dims_p[i + 1] for i in range(num_layers))
                   + 4 * sum(dims_p[1:]))
        io_tile_bytes = wsize * tn * dims_p[0] + 4 * tn * dims_p[-1]
        act_bytes = tn * max(dims_p) * (4 + 4 + wsize)
        vmem_needed = w_buf * w_bytes + 2 * io_tile_bytes + act_bytes

        vmem_cap = 64 << 20  # conservative default (v7x per-TC VMEM)
        try:
            vmem_cap = int(pltpu.get_tpu_info().vmem_capacity_bytes)
        except Exception:
            pass
        budget = (vmem_cap * 3) // 4  # ~25% headroom for Mosaic internal scratch

        # TODO(synk): when resident weights exceed the budget (very wide hidden
        # layers, especially on v7x's 64 MiB VMEM), keep weights in HBM
        # (memory_space=pl.ANY) and stream K-tiles via pltpu.emit_pipeline
        # instead of asserting out.
        assert vmem_needed <= budget, (
            f"fused-MLP VMEM footprint {vmem_needed >> 20} MiB exceeds budget "
            f"{budget >> 20} MiB; reduce tile_n / hidden width or add K-streaming")
        vmem_limit = int(min(max(vmem_needed + (4 << 20), 16 << 20), budget))

        # ---- advisory cost estimate for the XLA scheduler ----
        flops = 2 * n_pad * sum(dims_p[i] * dims_p[i + 1] for i in range(num_layers))
        cost = pl.CostEstimate(
            flops=flops,
            transcendentals=n_pad * (dims_p[-1] + 1),
            bytes_accessed=(wsize * n_pad * dims_p[0]
                            + 4 * n_pad * dims_p[-1] + w_bytes),
        )

        # TODO(synk): for small-batch serving on v5e, the weight DMA prologue
        # dominates; a cross-call weight prefetch (semaphore-valued outputs)
        # would hide it behind preceding layers.
        out_p = pl.pallas_call(
            kernel,
            out_shape=jax.ShapeDtypeStruct((n_pad, dims_p[-1]), jnp.float32),
            grid_spec=pltpu.PrefetchScalarGridSpec(
                num_scalar_prefetch=0,
                grid=(grid,),
                in_specs=in_specs,
                out_specs=out_spec,
            ),
            compiler_params=pltpu.CompilerParams(
                dimension_semantics=("parallel",),
                vmem_limit_bytes=vmem_limit,
            ),
            cost_estimate=cost,
        )(x_p, *wb)

        return out_p[:n, :out_channels]

    return forward


def _run_forward(meta, x, wb, **kwargs):
    """Build, jit and run the forward.  Falls back to default (double)
    buffering of the weight specs if this JAX/Mosaic build rejects
    single-buffered (pl.Buffered(1)) block specs."""
    try:
        fwd = jax.jit(make_mlp_forward(meta, **kwargs))
        return fwd, jax.block_until_ready(fwd(x, wb))
    except Exception:
        fwd = jax.jit(make_mlp_forward(meta, single_buffer_weights=False, **kwargs))
        return fwd, jax.block_until_ready(fwd(x, wb))


# ----------------------------------------------------------------------------
# Synthetic parameters matching torch.nn module shapes
# ----------------------------------------------------------------------------
def init_mlp_params(key, in_channels, hidden_channels, out_channels, num_layers):
    dims = [in_channels] + [hidden_channels] * (num_layers - 1) + [out_channels]
    params = {"fcs": [], "bns": []}
    for i in range(num_layers):
        key, kw, kb = jax.random.split(key, 3)
        f_in, f_out = dims[i], dims[i + 1]
        w = jax.random.normal(kw, (f_in, f_out), jnp.float32) * (1.0 / jnp.sqrt(f_in))
        b = jax.random.normal(kb, (1, f_out), jnp.float32) * 0.01
        params["fcs"].append((w, b))
        if i < num_layers - 1:  # BatchNorm1d after every fc except the last
            key, kg, kbeta, km, kv = jax.random.split(key, 5)
            gamma = 1.0 + 0.1 * jax.random.normal(kg, (1, f_out), jnp.float32)
            beta = 0.1 * jax.random.normal(kbeta, (1, f_out), jnp.float32)
            running_mean = 0.1 * jax.random.normal(km, (1, f_out), jnp.float32)
            running_var = 1.0 + 0.1 * jax.random.uniform(kv, (1, f_out), jnp.float32)
            params["bns"].append((gamma, beta, running_mean, running_var))
    return params


# ----------------------------------------------------------------------------
# Pure-JAX reference (eval-mode semantics)
# ----------------------------------------------------------------------------
def mlp_forward_ref(x, params, eps=1e-5):
    n_layers = len(params["fcs"])
    for i in range(n_layers - 1):
        w, b = params["fcs"][i]
        gamma, beta, mean, var = params["bns"][i]
        y = x @ w + b
        y = (y - mean) / jnp.sqrt(var + eps) * gamma + beta
        x = jnp.maximum(y, 0.0)
    w, b = params["fcs"][-1]
    return jax.nn.log_softmax(x @ w + b, axis=-1)


if __name__ == "__main__":
    key = jax.random.PRNGKey(0)
    kx, kp = jax.random.split(key)

    batch = 8
    in_channels = 16
    hidden_channels = 32
    out_channels = 8
    num_layers = 3
    dropout = 0.5  # identity in eval mode
    # TODO(synk): training-mode dropout / batch-statistic BatchNorm not
    # implemented (module is evaluated with eval() semantics).

    x = jax.random.normal(kx, (batch, in_channels), jnp.float32)
    params = init_mlp_params(kp, in_channels, hidden_channels, out_channels,
                             num_layers)

    ref = mlp_forward_ref(x, params)

    # f32 matmul path (exact check).  Parameters prepared ONCE, reused per call.
    wb32, meta32 = prepare_mlp_params(params, matmul_dtype=jnp.float32)
    fwd32, out32 = _run_forward(meta32, x, wb32)
    assert out32.shape == (batch, out_channels)
    assert jnp.allclose(out32, ref, atol=1e-4, rtol=1e-4), "f32 mismatch vs reference"

    # bf16 MXU fast path (recommended default on v6e/v7x): bf16 weights cast in
    # the wrapper, f32 accumulation, f32 element-wise math.
    wb16, meta16 = prepare_mlp_params(params, matmul_dtype=jnp.bfloat16)
    fwd16, out16 = _run_forward(meta16, x, wb16)
    assert out16.shape == (batch, out_channels)
    assert jnp.allclose(out16, ref, atol=1e-1, rtol=1e-1), "bf16 mismatch vs reference"

    print("KERNEL_OK")
</pallas_src>

<mosaic_0001>
module attributes {stable_mosaic.version = 11 : i64} {
  func.func @kernel(%arg0: i32, %arg1: memref<8x128xf32, #tpu.memory_space<vmem>>, %arg2: memref<128x128xf32, #tpu.memory_space<vmem>>, %arg3: memref<1x128xf32, #tpu.memory_space<vmem>>, %arg4: memref<128x128xf32, #tpu.memory_space<vmem>>, %arg5: memref<1x128xf32, #tpu.memory_space<vmem>>, %arg6: memref<128x128xf32, #tpu.memory_space<vmem>>, %arg7: memref<1x128xf32, #tpu.memory_space<vmem>>, %arg8: memref<8x128xf32, #tpu.memory_space<vmem>>) attributes {dimension_semantics = [#tpu.dimension_semantics<parallel>], iteration_bounds = array<i64: 1>, scalar_prefetch = 0 : i64, scratch_operands = 0 : i64, tpu.core_type = #tpu.core_type<tc>, window_params = [{transform_indices = @transform_0, window_bounds = array<i64: 8, 128>}, {pipeline_mode = #tpu.pipeline_mode<synchronous>, transform_indices = @transform_1, window_bounds = array<i64: 128, 128>}, {pipeline_mode = #tpu.pipeline_mode<synchronous>, transform_indices = @transform_2, window_bounds = array<i64: 1, 128>}, {pipeline_mode = #tpu.pipeline_mode<synchronous>, transform_indices = @transform_3, window_bounds = array<i64: 128, 128>}, {pipeline_mode = #tpu.pipeline_mode<synchronous>, transform_indices = @transform_4, window_bounds = array<i64: 1, 128>}, {pipeline_mode = #tpu.pipeline_mode<synchronous>, transform_indices = @transform_5, window_bounds = array<i64: 128, 128>}, {pipeline_mode = #tpu.pipeline_mode<synchronous>, transform_indices = @transform_6, window_bounds = array<i64: 1, 128>}, {transform_indices = @transform_7, window_bounds = array<i64: 8, 128>}]} {
    %c0 = arith.constant 0 : index
    %c0_0 = arith.constant 0 : index
    %0 = vector.load %arg1[%c0, %c0_0] : memref<8x128xf32, #tpu.memory_space<vmem>>, vector<8x128xf32>
    %c0_1 = arith.constant 0 : index
    %c0_2 = arith.constant 0 : index
    %1 = vector.load %arg2[%c0_1, %c0_2] : memref<128x128xf32, #tpu.memory_space<vmem>>, vector<128x128xf32>
    %c0_3 = arith.constant 0 : index
    %c0_4 = arith.constant 0 : index
    %2 = vector.load %arg3[%c0_3, %c0_4] : memref<1x128xf32, #tpu.memory_space<vmem>>, vector<1x128xf32>
    %cst = arith.constant dense<0.000000e+00> : vector<8x128xf32>
    %3 = tpu.matmul %0, %1, %cst {dimension_numbers = #tpu.dot_dimension_numbers<[1], [0], [0], [1], [0, 0, 1, 1], [], []>} : vector<8x128xf32>, vector<128x128xf32>, vector<8x128xf32> -> vector<8x128xf32>
    %4 = vector.broadcast %2 : vector<1x128xf32> to vector<8x128xf32>
    %5 = arith.addf %3, %4 : vector<8x128xf32>
    %cst_5 = arith.constant 0.000000e+00 : f32
    %6 = vector.broadcast %cst_5 : f32 to vector<8x128xf32>
    %7 = arith.maximumf %5, %6 : vector<8x128xf32>
    %c0_6 = arith.constant 0 : index
    %c0_7 = arith.constant 0 : index
    %8 = vector.load %arg4[%c0_6, %c0_7] : memref<128x128xf32, #tpu.memory_space<vmem>>, vector<128x128xf32>
    %c0_8 = arith.constant 0 : index
    %c0_9 = arith.constant 0 : index
    %9 = vector.load %arg5[%c0_8, %c0_9] : memref<1x128xf32, #tpu.memory_space<vmem>>, vector<1x128xf32>
    %cst_10 = arith.constant dense<0.000000e+00> : vector<8x128xf32>
    %10 = tpu.matmul %7, %8, %cst_10 {dimension_numbers = #tpu.dot_dimension_numbers<[1], [0], [0], [1], [0, 0, 1, 1], [], []>} : vector<8x128xf32>, vector<128x128xf32>, vector<8x128xf32> -> vector<8x128xf32>
    %11 = vector.broadcast %9 : vector<1x128xf32> to vector<8x128xf32>
    %12 = arith.addf %10, %11 : vector<8x128xf32>
    %cst_11 = arith.constant 0.000000e+00 : f32
    %13 = vector.broadcast %cst_11 : f32 to vector<8x128xf32>
    %14 = arith.maximumf %12, %13 : vector<8x128xf32>
    %c0_12 = arith.constant 0 : index
    %c0_13 = arith.constant 0 : index
    %15 = vector.load %arg6[%c0_12, %c0_13] : memref<128x128xf32, #tpu.memory_space<vmem>>, vector<128x128xf32>
    %cst_14 = arith.constant dense<0.000000e+00> : vector<8x128xf32>
    %16 = tpu.matmul %14, %15, %cst_14 {dimension_numbers = #tpu.dot_dimension_numbers<[1], [0], [0], [1], [0, 0, 1, 1], [], []>} : vector<8x128xf32>, vector<128x128xf32>, vector<8x128xf32> -> vector<8x128xf32>
    %c0_15 = arith.constant 0 : index
    %c0_16 = arith.constant 0 : index
    %17 = vector.load %arg7[%c0_15, %c0_16] : memref<1x128xf32, #tpu.memory_space<vmem>>, vector<1x128xf32>
    %18 = vector.broadcast %17 : vector<1x128xf32> to vector<8x128xf32>
    %19 = arith.addf %16, %18 : vector<8x128xf32>
    %20 = tpu.iota {dimensions = array<i32: 1>} : vector<8x128xi32>
    %c8_i32 = arith.constant 8 : i32
    %21 = vector.broadcast %c8_i32 : i32 to vector<8x128xi32>
    %22 = arith.cmpi slt, %20, %21 : vector<8x128xi32>
    %cst_17 = arith.constant -1.000000e+30 : f32
    %23 = vector.broadcast %cst_17 : f32 to vector<8x128xf32>
    %24 = arith.select %22, %19, %23 : vector<8x128xi1>, vector<8x128xf32>
    %cst_18 = arith.constant dense<0xFF800000> : vector<8xf32>
    %25 = vector.multi_reduction <maximumf>, %24, %cst_18 [1] : vector<8x128xf32> to vector<8xf32>
    %26 = vector.shape_cast %25 : vector<8xf32> to vector<8x1xf32>
    %27 = vector.broadcast %26 : vector<8x1xf32> to vector<8x128xf32>
    %28 = arith.subf %24, %27 : vector<8x128xf32>
    %29 = math.exp %28 : vector<8x128xf32>
    %cst_19 = arith.constant dense<0.000000e+00> : vector<8xf32>
    %30 = vector.multi_reduction <add>, %29, %cst_19 [1] : vector<8x128xf32> to vector<8xf32>
    %31 = vector.shape_cast %30 : vector<8xf32> to vector<8x1xf32>
    %32 = math.log %31 : vector<8x1xf32>
    %33 = vector.broadcast %32 : vector<8x1xf32> to vector<8x128xf32>
    %34 = arith.subf %28, %33 : vector<8x128xf32>
    %c0_20 = arith.constant 0 : index
    %c0_21 = arith.constant 0 : index
    %35 = vector.load %arg8[%c0_20, %c0_21] : memref<8x128xf32, #tpu.memory_space<vmem>>, vector<8x128xf32>
    tpu.vector_store %arg8[%c0_20, %c0_21], %34 {strides = array<i32>} : memref<8x128xf32, #tpu.memory_space<vmem>>, vector<8x128xf32>,
    return
  }
  func.func @transform_0(%arg0: i32) -> (i32, i32) {
    %c0_i32 = arith.constant 0 : i32
    %c0_i32_0 = arith.constant 0 : i32
    return %arg0, %c0_i32 : i32, i32
  }
  func.func @transform_1(%arg0: i32) -> (i32, i32) {
    %c0_i32 = arith.constant 0 : i32
    %c0_i32_0 = arith.constant 0 : i32
    %c0_i32_1 = arith.constant 0 : i32
    return %c0_i32, %c0_i32_0 : i32, i32
  }
  func.func @transform_2(%arg0: i32) -> (i32, i32) {
    %c0_i32 = arith.constant 0 : i32
    %c0_i32_0 = arith.constant 0 : i32
    %c0_i32_1 = arith.constant 0 : i32
    return %c0_i32, %c0_i32_0 : i32, i32
  }
  func.func @transform_3(%arg0: i32) -> (i32, i32) {
    %c0_i32 = arith.constant 0 : i32
    %c0_i32_0 = arith.constant 0 : i32
    %c0_i32_1 = arith.constant 0 : i32
    return %c0_i32, %c0_i32_0 : i32, i32
  }
  func.func @transform_4(%arg0: i32) -> (i32, i32) {
    %c0_i32 = arith.constant 0 : i32
    %c0_i32_0 = arith.constant 0 : i32
    %c0_i32_1 = arith.constant 0 : i32
    return %c0_i32, %c0_i32_0 : i32, i32
  }
  func.func @transform_5(%arg0: i32) -> (i32, i32) {
    %c0_i32 = arith.constant 0 : i32
    %c0_i32_0 = arith.constant 0 : i32
    %c0_i32_1 = arith.constant 0 : i32
    return %c0_i32, %c0_i32_0 : i32, i32
  }
  func.func @transform_6(%arg0: i32) -> (i32, i32) {
    %c0_i32 = arith.constant 0 : i32
    %c0_i32_0 = arith.constant 0 : i32
    %c0_i32_1 = arith.constant 0 : i32
    return %c0_i32, %c0_i32_0 : i32, i32
  }
  func.func @transform_7(%arg0: i32) -> (i32, i32) {
    %c0_i32 = arith.constant 0 : i32
    %c0_i32_0 = arith.constant 0 : i32
    return %arg0, %c0_i32 : i32, i32
  }
}

module attributes {stable_mosaic.version = 11 : i64} {
  func.func @kernel(%arg0: i32, %arg1: memref<8x128xf32, #tpu.memory_space<vmem>>, %arg2: memref<128x128xf32, #tpu.memory_space<vmem>>, %arg3: memref<1x128xf32, #tpu.memory_space<vmem>>, %arg4: memref<128x128xf32, #tpu.memory_space<vmem>>, %arg5: memref<1x128xf32, #tpu.memory_space<vmem>>, %arg6: memref<128x128xf32, #tpu.memory_space<vmem>>, %arg7: memref<1x128xf32, #tpu.memory_space<vmem>>, %arg8: memref<8x128xf32, #tpu.memory_space<vmem>>) attributes {dimension_semantics = [#tpu.dimension_semantics<parallel>], iteration_bounds = array<i64: 1>, scalar_prefetch = 0 : i64, scratch_operands = 0 : i64, tpu.core_type = #tpu.core_type<tc>, window_params = [{transform_indices = @transform_0, window_bounds = array<i64: 8, 128>}, {pipeline_mode = #tpu.pipeline_mode<synchronous>, transform_indices = @transform_1, window_bounds = array<i64: 128, 128>}, {pipeline_mode = #tpu.pipeline_mode<synchronous>, transform_indices = @transform_2, window_bounds = array<i64: 1, 128>}, {pipeline_mode = #tpu.pipeline_mode<synchronous>, transform_indices = @transform_3, window_bounds = array<i64: 128, 128>}, {pipeline_mode = #tpu.pipeline_mode<synchronous>, transform_indices = @transform_4, window_bounds = array<i64: 1, 128>}, {pipeline_mode = #tpu.pipeline_mode<synchronous>, transform_indices = @transform_5, window_bounds = array<i64: 128, 128>}, {pipeline_mode = #tpu.pipeline_mode<synchronous>, transform_indices = @transform_6, window_bounds = array<i64: 1, 128>}, {transform_indices = @transform_7, window_bounds = array<i64: 8, 128>}]} {
    %c0 = arith.constant 0 : index
    %c0_0 = arith.constant 0 : index
    %0 = vector.load %arg1[%c0, %c0_0] : memref<8x128xf32, #tpu.memory_space<vmem>>, vector<8x128xf32>
    %c0_1 = arith.constant 0 : index
    %c0_2 = arith.constant 0 : index
    %1 = vector.load %arg2[%c0_1, %c0_2] : memref<128x128xf32, #tpu.memory_space<vmem>>, vector<128x128xf32>
    %c0_3 = arith.constant 0 : index
    %c0_4 = arith.constant 0 : index
    %2 = vector.load %arg3[%c0_3, %c0_4] : memref<1x128xf32, #tpu.memory_space<vmem>>, vector<1x128xf32>
    %cst = arith.constant dense<0.000000e+00> : vector<8x128xf32>
    %3 = tpu.matmul %0, %1, %cst {dimension_numbers = #tpu.dot_dimension_numbers<[1], [0], [0], [1], [0, 0, 1, 1], [], []>} : vector<8x128xf32>, vector<128x128xf32>, vector<8x128xf32> -> vector<8x128xf32>
    %4 = vector.broadcast %2 : vector<1x128xf32> to vector<8x128xf32>
    %5 = arith.addf %3, %4 : vector<8x128xf32>
    %cst_5 = arith.constant 0.000000e+00 : f32
    %6 = vector.broadcast %cst_5 : f32 to vector<8x128xf32>
    %7 = arith.maximumf %5, %6 : vector<8x128xf32>
    %c0_6 = arith.constant 0 : index
    %c0_7 = arith.constant 0 : index
    %8 = vector.load %arg4[%c0_6, %c0_7] : memref<128x128xf32, #tpu.memory_space<vmem>>, vector<128x128xf32>
    %c0_8 = arith.constant 0 : index
    %c0_9 = arith.constant 0 : index
    %9 = vector.load %arg5[%c0_8, %c0_9] : memref<1x128xf32, #tpu.memory_space<vmem>>, vector<1x128xf32>
    %cst_10 = arith.constant dense<0.000000e+00> : vector<8x128xf32>
    %10 = tpu.matmul %7, %8, %cst_10 {dimension_numbers = #tpu.dot_dimension_numbers<[1], [0], [0], [1], [0, 0, 1, 1], [], []>} : vector<8x128xf32>, vector<128x128xf32>, vector<8x128xf32> -> vector<8x128xf32>
    %11 = vector.broadcast %9 : vector<1x128xf32> to vector<8x128xf32>
    %12 = arith.addf %10, %11 : vector<8x128xf32>
    %cst_11 = arith.constant 0.000000e+00 : f32
    %13 = vector.broadcast %cst_11 : f32 to vector<8x128xf32>
    %14 = arith.maximumf %12, %13 : vector<8x128xf32>
    %c0_12 = arith.constant 0 : index
    %c0_13 = arith.constant 0 : index
    %15 = vector.load %arg6[%c0_12, %c0_13] : memref<128x128xf32, #tpu.memory_space<vmem>>, vector<128x128xf32>
    %cst_14 = arith.constant dense<0.000000e+00> : vector<8x128xf32>
    %16 = tpu.matmul %14, %15, %cst_14 {dimension_numbers = #tpu.dot_dimension_numbers<[1], [0], [0], [1], [0, 0, 1, 1], [], []>} : vector<8x128xf32>, vector<128x128xf32>, vector<8x128xf32> -> vector<8x128xf32>
    %c0_15 = arith.constant 0 : index
    %c0_16 = arith.constant 0 : index
    %17 = vector.load %arg7[%c0_15, %c0_16] : memref<1x128xf32, #tpu.memory_space<vmem>>, vector<1x128xf32>
    %18 = vector.broadcast %17 : vector<1x128xf32> to vector<8x128xf32>
    %19 = arith.addf %16, %18 : vector<8x128xf32>
    %20 = tpu.iota {dimensions = array<i32: 1>} : vector<8x128xi32>
    %c8_i32 = arith.constant 8 : i32
    %21 = vector.broadcast %c8_i32 : i32 to vector<8x128xi32>
    %22 = arith.cmpi slt, %20, %21 : vector<8x128xi32>
    %cst_17 = arith.constant -1.000000e+30 : f32
    %23 = vector.broadcast %cst_17 : f32 to vector<8x128xf32>
    %24 = arith.select %22, %19, %23 : vector<8x128xi1>, vector<8x128xf32>
    %cst_18 = arith.constant dense<0xFF800000> : vector<8xf32>
    %25 = vector.multi_reduction <maximumf>, %24, %cst_18 [1] : vector<8x128xf32> to vector<8xf32>
    %26 = vector.shape_cast %25 : vector<8xf32> to vector<8x1xf32>
    %27 = vector.broadcast %26 : vector<8x1xf32> to vector<8x128xf32>
    %28 = arith.subf %24, %27 : vector<8x128xf32>
    %29 = math.exp %28 : vector<8x128xf32>
    %cst_19 = arith.constant dense<0.000000e+00> : vector<8xf32>
    %30 = vector.multi_reduction <add>, %29, %cst_19 [1] : vector<8x128xf32> to vector<8xf32>
    %31 = vector.shape_cast %30 : vector<8xf32> to vector<8x1xf32>
    %32 = math.log %31 : vector<8x1xf32>
    %33 = vector.broadcast %32 : vector<8x1xf32> to vector<8x128xf32>
    %34 = arith.subf %28, %33 : vector<8x128xf32>
    %c0_20 = arith.constant 0 : index
    %c0_21 = arith.constant 0 : index
    %35 = vector.load %arg8[%c0_20, %c0_21] : memref<8x128xf32, #tpu.memory_space<vmem>>, vector<8x128xf32>
    tpu.vector_store %arg8[%c0_20, %c0_21], %34 {strides = array<i32>} : memref<8x128xf32, #tpu.memory_space<vmem>>, vector<8x128xf32>,
    return
  }
  func.func @transform_0(%arg0: i32) -> (i32, i32) {
    %c0_i32 = arith.constant 0 : i32
    %c0_i32_0 = arith.constant 0 : i32
    return %arg0, %c0_i32 : i32, i32
  }
  func.func @transform_1(%arg0: i32) -> (i32, i32) {
    %c0_i32 = arith.constant 0 : i32
    %c0_i32_0 = arith.constant 0 : i32
    %c0_i32_1 = arith.constant 0 : i32
    return %c0_i32, %c0_i32_0 : i32, i32
  }
  func.func @transform_2(%arg0: i32) -> (i32, i32) {
    %c0_i32 = arith.constant 0 : i32
    %c0_i32_0 = arith.constant 0 : i32
    %c0_i32_1 = arith.constant 0 : i32
    return %c0_i32, %c0_i32_0 : i32, i32
  }
  func.func @transform_3(%arg0: i32) -> (i32, i32) {
    %c0_i32 = arith.constant 0 : i32
    %c0_i32_0 = arith.constant 0 : i32
    %c0_i32_1 = arith.constant 0 : i32
    return %c0_i32, %c0_i32_0 : i32, i32
  }
  func.func @transform_4(%arg0: i32) -> (i32, i32) {
    %c0_i32 = arith.constant 0 : i32
    %c0_i32_0 = arith.constant 0 : i32
    %c0_i32_1 = arith.constant 0 : i32
    return %c0_i32, %c0_i32_0 : i32, i32
  }
  func.func @transform_5(%arg0: i32) -> (i32, i32) {
    %c0_i32 = arith.constant 0 : i32
    %c0_i32_0 = arith.constant 0 : i32
    %c0_i32_1 = arith.constant 0 : i32
    return %c0_i32, %c0_i32_0 : i32, i32
  }
  func.func @transform_6(%arg0: i32) -> (i32, i32) {
    %c0_i32 = arith.constant 0 : i32
    %c0_i32_0 = arith.constant 0 : i32
    %c0_i32_1 = arith.constant 0 : i32
    return %c0_i32, %c0_i32_0 : i32, i32
  }
  func.func @transform_7(%arg0: i32) -> (i32, i32) {
    %c0_i32 = arith.constant 0 : i32
    %c0_i32_0 = arith.constant 0 : i32
    return %arg0, %c0_i32 : i32, i32
  }
}

</mosaic_0001>

<bundles_post_ra>
// kernel: forward.1
= control target key start
LH: loop header
LB: loop body
LE: loop exit
PB: predicated region body
PF: predicated region fallthrough
CT: control target
= control target key end

     0   :  { %12 = vsyncpa [#allocation3], 0  ;;  %s764_s0 = inlined_call_operand.vmem [shape: f32[8,128], index: 0, kind: input, shape index: {}]   ;;  %s765_s1 = inlined_call_operand.hbm [shape: f32[128,128], index: 1, kind: input, shape index: {}]   ;;  %s766_s2 = inlined_call_operand.vmem [shape: f32[1,128], index: 2, kind: input, shape index: {}]   ;;  %s767_s3 = inlined_call_operand.hbm [shape: f32[128,128], index: 3, kind: input, shape index: {}]   ;;  %s768_s4 = inlined_call_operand.vmem [shape: f32[1,128], index: 4, kind: input, shape index: {}]   ;;  %s769_s5 = inlined_call_operand.hbm [shape: f32[128,128], index: 5, kind: input, shape index: {}]   ;;  %s770_s6 = inlined_call_operand.vmem [shape: f32[1,128], index: 6, kind: input, shape index: {}]   ;;  %s771_s7 = inlined_call_operand.hbm [shape: f32[8,128], index: 7, kind: output, shape index: {}]  }
   0x1   :  { %13 = vsyncpa [#allocation6], 0 }
   0x2   :  { %14 = vsyncpa [#allocation4], 0  ;;  %s638_s24 = smov [#allocation5]   ;;  %s639_s26 = smov [#allocation2]  }
   0x3   :  { %s36_s25 = sshll.u32 %s638_s24, 4  ;;  %s22_s27 = sshll.u32 %s639_s26, 4  ;;  %s37_s25 = int_to_ptr.vmem [resolvable:$true] %s36_s25  ;;  %s23_s27 = int_to_ptr.vmem [resolvable:$true] %s22_s27 }
   0x4   :  { %s560_s28 = scalar_lea.vmem %s37_s25, 2048  ;;  %p565_p1 = scmp.lt.s32.totalorder %s37_s25, %s37_s25 }
   0x5   :  { %p561_p0 = scmp.ne.s32.totalorder %s37_s25, %s560_s28  ;;  %p566_p2 = scmp.lt.s32.totalorder %s560_s28, %s560_s28 }
   0x7   :  { %p567_p3 = por %p566_p2, %p565_p1 }
   0x9   :  { %p568_p4 = pnand %p567_p3, %p561_p0 }
   0xb   :  { %571 = shalt.err (!%p568_p4)
}
   0xc   :  { %s640_s29 = smov 128   ;;  %s641_s30 = smov 8  }
   0xd   :  { %42 = dma.hbm_to_vmem [thread:$0]  %s767_s3, 2048, %s37_s25, [#allocation6], %s640_s29, %s640_s29, %s641_s30  }
   0xe   :  { %s580_s10 = scalar_lea.vmem %s23_s27, 2048  ;;  %p585_p6 = scmp.lt.s32.totalorder %s23_s27, %s23_s27 }
   0xf   :  { %p581_p5 = scmp.ne.s32.totalorder %s23_s27, %s580_s10  ;;  %p586_p7 = scmp.lt.s32.totalorder %s580_s10, %s580_s10 }
  0x11   :  { %p587_p8 = por %p586_p7, %p585_p6 }
  0x13   :  { %p588_p9 = pnand %p587_p8, %p581_p5 }
  0x15   :  { %591 = shalt.err (!%p588_p9)
}
  0x16   :  { %28 = dma.hbm_to_vmem [thread:$0]  %s765_s1, 2048, %s23_s27, [#allocation3], %s640_s29, %s640_s29, %s641_s30  }
  0x17   :  { %s642_s13 = smov [#allocation7]  }
  0x18   :  { %s50_s14 = sshll.u32 %s642_s13, 4  ;;  %s51_s14 = int_to_ptr.vmem [resolvable:$true] %s50_s14 }
  0x19   :  { %s600_s15 = scalar_lea.vmem %s51_s14, 2048  ;;  %p605_p11 = scmp.lt.s32.totalorder %s51_s14, %s51_s14 }
  0x1a   :  { %p601_p10 = scmp.ne.s32.totalorder %s51_s14, %s600_s15  ;;  %p606_p12 = scmp.lt.s32.totalorder %s600_s15, %s600_s15 }
  0x1c   :  { %p607_p13 = por %p606_p12, %p605_p11 }
  0x1e   :  { %p608_p0 = pnand %p607_p13, %p601_p10 }
  0x20   :  { %611 = shalt.err (!%p608_p0)
}
  0x21   :  { %56 = dma.hbm_to_vmem [thread:$0]  %s769_s5, 2048, %s51_s14, [#allocation6], %s640_s29, %s640_s29, %s641_s30  }
  0x22   :  { %632 = dma.done.wait [#allocation3], 2048  }
  0x23   :  { %633 = vsyncadd [#allocation3], 4294965248 }
  0x24   :  { %634 = dma.done.wait [#allocation6], 4096  }
  0x25   :  { %635 = vsyncadd [#allocation6], 4294963200  ;;  %v643_v0 = vmov 0.0   ;;  %vm644_vm0 = vmmov 0   ;;  %v84_v1 = vld [vmem:[#allocation2 + $0x78] sm:$0xff]  ;;  %v83_v2 = vld [vmem:[#allocation2 + $0x70] sm:$0xff]  ;;  %v350_v60 = vlaneseq }
  0x26   :  { %435 = vmatprep.subr.mxu0 %v643_v0  ;;  %467 = vmatprep.mubr.msk.f32.mxu0 %vm644_vm0, %v643_v0  ;;  %v82_v3 = vld [vmem:[#allocation2 + $0x68] sm:$0xff]  ;;  %v81_v4 = vld [vmem:[#allocation2 + $0x60] sm:$0xff]  ;;  %v178_v5 = vld [vmem:[#allocation5 + $0x78] sm:$0xff] }
  0x27   :  { %470 = vmatprep.subr.mxu1 %v643_v0  ;;  %502 = vmatprep.mubr.msk.f32.mxu1 %vm644_vm0, %v643_v0  ;;  %v80_v6 = vld [vmem:[#allocation2 + $0x58] sm:$0xff]  ;;  %v177_v7 = vld [vmem:[#allocation5 + $0x70] sm:$0xff]  ;;  %v176_v8 = vld [vmem:[#allocation5 + $0x68] sm:$0xff]  ;;  %v351_v61 = vand.u32 127, %v350_v60 }
  0x28   :  { %436 = vmatpush3.msra.mxu0 %v84_v1  ;;  %471 = vmatpush3.msra.mxu1 %v178_v5  ;;  %v79_v9 = vld [vmem:[#allocation2 + $0x50] sm:$0xff]  ;;  %v175_v10 = vld [vmem:[#allocation5 + $0x60] sm:$0xff]  ;;  %v78_v11 = vld [vmem:[#allocation2 + $0x48] sm:$0xff] }
  0x29   :  { %437 = vmatprep.subr.mxu0 %v643_v0  ;;  %472 = vmatprep.subr.mxu1 %v643_v0  ;;  %v174_v12 = vld [vmem:[#allocation5 + $0x58] sm:$0xff]  ;;  %v77_v13 = vld [vmem:[#allocation2 + $0x40] sm:$0xff]  ;;  %v173_v14 = vld [vmem:[#allocation5 + $0x50] sm:$0xff]  ;;  %vm352_vm1 = vcmp.lt.s32.totalorder %v351_v61, 8 }
  0x2a   :  { %438 = vmatpush3.msra.mxu0 %v83_v2  ;;  %473 = vmatpush3.msra.mxu1 %v177_v7  ;;  %v76_v15 = vld [vmem:[#allocation2 + $0x38] sm:$0xff]  ;;  %v172_v16 = vld [vmem:[#allocation5 + $0x48] sm:$0xff]  ;;  %v75_v17 = vld [vmem:[#allocation2 + $0x30] sm:$0xff] }
  0x2b   :  { %439 = vmatprep.subr.mxu0 %v643_v0  ;;  %474 = vmatprep.subr.mxu1 %v643_v0  ;;  %v171_v18 = vld [vmem:[#allocation5 + $0x40] sm:$0xff]  ;;  %v74_v19 = vld [vmem:[#allocation2 + $0x28] sm:$0xff]  ;;  %v170_v20 = vld [vmem:[#allocation5 + $0x38] sm:$0xff] }
  0x2c   :  { %440 = vmatpush3.msra.mxu0 %v82_v3  ;;  %475 = vmatpush3.msra.mxu1 %v176_v8  ;;  %v73_v21 = vld [vmem:[#allocation2 + $0x20] sm:$0xff]  ;;  %v169_v22 = vld [vmem:[#allocation5 + $0x30] sm:$0xff]  ;;  %v72_v23 = vld [vmem:[#allocation2 + $0x18] sm:$0xff] }
  0x2d   :  { %441 = vmatprep.subr.mxu0 %v643_v0  ;;  %476 = vmatprep.subr.mxu1 %v643_v0  ;;  %v168_v24 = vld [vmem:[#allocation5 + $0x28] sm:$0xff]  ;;  %v71_v25 = vld [vmem:[#allocation2 + $0x10] sm:$0xff]  ;;  %v167_v26 = vld [vmem:[#allocation5 + $0x20] sm:$0xff] }
  0x2e   :  { %442 = vmatpush3.msra.mxu0 %v81_v4  ;;  %477 = vmatpush3.msra.mxu1 %v175_v10  ;;  %v70_v27 = vld [vmem:[#allocation2 + $0x8] sm:$0xff]  ;;  %v166_v28 = vld [vmem:[#allocation5 + $0x18] sm:$0xff]  ;;  %v69_v29 = vld [vmem:[#allocation2] sm:$0xff] }
  0x2f   :  { %443 = vmatprep.subr.mxu0 %v643_v0  ;;  %478 = vmatprep.subr.mxu1 %v643_v0  ;;  %v68_v30 = vld [vmem:[%s764_s0] sm:$0xff]  ;;  %v165_v31 = vld [vmem:[#allocation5 + $0x10] sm:$0xff]  ;;  %v164_v32 = vld [vmem:[#allocation5 + $0x8] sm:$0xff] }
  0x30   :  { %444 = vmatpush3.msra.mxu0 %v80_v6  ;;  %479 = vmatpush3.msra.mxu1 %v174_v12  ;;  %v163_v33 = vld [vmem:[#allocation5] sm:$0xff]  ;;  %v272_v34 = vld [vmem:[#allocation7 + $0x78] sm:$0xff]  ;;  %v271_v35 = vld [vmem:[#allocation7 + $0x70] sm:$0xff] }
  0x31   :  { %445 = vmatprep.subr.mxu0 %v643_v0  ;;  %480 = vmatprep.subr.mxu1 %v643_v0  ;;  %v270_v36 = vld [vmem:[#allocation7 + $0x68] sm:$0xff]  ;;  %v269_v37 = vld [vmem:[#allocation7 + $0x60] sm:$0xff]  ;;  %v268_v38 = vld [vmem:[#allocation7 + $0x58] sm:$0xff] }
  0x32   :  { %446 = vmatpush3.msra.mxu0 %v79_v9  ;;  %481 = vmatpush3.msra.mxu1 %v173_v14  ;;  %v267_v39 = vld [vmem:[#allocation7 + $0x50] sm:$0xff]  ;;  %v266_v40 = vld [vmem:[#allocation7 + $0x48] sm:$0xff]  ;;  %v265_v41 = vld [vmem:[#allocation7 + $0x40] sm:$0xff] }
  0x33   :  { %447 = vmatprep.subr.mxu0 %v643_v0  ;;  %482 = vmatprep.subr.mxu1 %v643_v0  ;;  %v264_v42 = vld [vmem:[#allocation7 + $0x38] sm:$0xff]  ;;  %v263_v43 = vld [vmem:[#allocation7 + $0x30] sm:$0xff]  ;;  %v262_v44 = vld [vmem:[#allocation7 + $0x28] sm:$0xff] }
  0x34   :  { %448 = vmatpush3.msra.mxu0 %v78_v11  ;;  %483 = vmatpush3.msra.mxu1 %v172_v16  ;;  %v261_v45 = vld [vmem:[#allocation7 + $0x20] sm:$0xff]  ;;  %v260_v46 = vld [vmem:[#allocation7 + $0x18] sm:$0xff]  ;;  %v259_v52 = vld [vmem:[#allocation7 + $0x10] sm:$0xff] }
  0x35   :  { %449 = vmatprep.subr.mxu0 %v643_v0  ;;  %484 = vmatprep.subr.mxu1 %v643_v0  ;;  %v381_v47 = vld [vmem:[%s766_s2] ss:$0 sm:$0xff]  ;;  %v258_v53 = vld [vmem:[#allocation7 + $0x8] sm:$0xff] }
  0x36   :  { %450 = vmatpush3.msra.mxu0 %v77_v13  ;;  %485 = vmatpush3.msra.mxu1 %v171_v18  ;;  %v257_v54 = vld [vmem:[#allocation7] sm:$0xff] }
  0x37   :  { %451 = vmatprep.subr.mxu0 %v643_v0  ;;  %486 = vmatprep.subr.mxu1 %v643_v0  ;;  %v382_v55 = vld [vmem:[%s768_s4] ss:$0 sm:$0xff]  ;;  %s645_s4 = smov [#allocation8]  }
  0x38   :  { %452 = vmatpush3.msra.mxu0 %v76_v15  ;;  %487 = vmatpush3.msra.mxu1 %v170_v20  ;;  %v383_v62 = vld [vmem:[%s770_s6] ss:$0 sm:$0xff]  ;;  %s371_s21 = sshll.u32 %s645_s4, 4  ;;  %s372_s21 = int_to_ptr.vmem [resolvable:$true] %s371_s21 }
  0x39   :  { %453 = vmatprep.subr.mxu0 %v643_v0  ;;  %488 = vmatprep.subr.mxu1 %v643_v0  ;;  %s612_s6 = scalar_lea.vmem %s372_s21, 128  ;;  %p617_p2 = scmp.lt.s32.totalorder %s372_s21, %s372_s21 }
  0x3a   :  { %454 = vmatpush3.msra.mxu0 %v75_v17  ;;  %489 = vmatpush3.msra.mxu1 %v169_v22  ;;  %p613_p1 = scmp.ne.s32.totalorder %s372_s21, %s612_s6  ;;  %p618_p3 = scmp.lt.s32.totalorder %s612_s6, %s612_s6 }
  0x3b   :  { %455 = vmatprep.subr.mxu0 %v643_v0  ;;  %490 = vmatprep.subr.mxu1 %v643_v0 }
  0x3c   :  { %456 = vmatpush3.msra.mxu0 %v74_v19  ;;  %491 = vmatpush3.msra.mxu1 %v168_v24  ;;  %p619_p4 = por %p618_p3, %p617_p2 }
  0x3d   :  { %457 = vmatprep.subr.mxu0 %v643_v0  ;;  %492 = vmatprep.subr.mxu1 %v643_v0 }
  0x3e   :  { %458 = vmatpush3.msra.mxu0 %v73_v21  ;;  %493 = vmatpush3.msra.mxu1 %v167_v26  ;;  %p620_p5 = pnand %p619_p4, %p613_p1 }
  0x3f   :  { %459 = vmatprep.subr.mxu0 %v643_v0  ;;  %494 = vmatprep.subr.mxu1 %v643_v0 }
  0x40   :  { %460 = vmatpush3.msra.mxu0 %v72_v23  ;;  %495 = vmatpush3.msra.mxu1 %v166_v28 }
  0x41   :  { %461 = vmatprep.subr.mxu0 %v643_v0  ;;  %496 = vmatprep.subr.mxu1 %v643_v0 }
  0x42   :  { %462 = vmatpush3.msra.mxu0 %v71_v25  ;;  %497 = vmatpush3.msra.mxu1 %v165_v31 }
  0x43   :  { %463 = vmatprep.subr.mxu0 %v643_v0  ;;  %498 = vmatprep.subr.mxu1 %v643_v0 }
  0x44   :  { %464 = vmatpush3.msra.mxu0 %v70_v27  ;;  %499 = vmatpush3.msra.mxu1 %v164_v32 }
  0x45   :  { %465 = vmatprep.subr.mxu0 %v643_v0  ;;  %500 = vmatprep.subr.mxu1 %v643_v0 }
  0x46   :  { %466 = vmatpush3.msra.mxu0 %v69_v29  ;;  %501 = vmatpush3.msra.mxu1 %v163_v33 }
  0x47   :  { %468 = vmatmul.mubr.f32.vlgmr.msra.gmra.mxu0 %v68_v30  ;;  %505 = vmatprep.subr.mxu0 %v643_v0 }
  0x48   :  { %537 = vmatprep.mubr.msk.f32.mxu0 %vm644_vm0, %v643_v0  ;;  %506 = vmatpush3.msra.mxu0 %v272_v34 }
  0x49   :  { %507 = vmatprep.subr.mxu0 %v643_v0 }
  0x4a   :  { %508 = vmatpush3.msra.mxu0 %v271_v35 }
  0x4b   :  { %509 = vmatprep.subr.mxu0 %v643_v0 }
  0x4c   :  { %510 = vmatpush3.msra.mxu0 %v270_v36 }
  0x4d   :  { %511 = vmatprep.subr.mxu0 %v643_v0 }
  0x4e   :  { %512 = vmatpush3.msra.mxu0 %v269_v37 }
  0x4f   :  { %513 = vmatprep.subr.mxu0 %v643_v0 }
  0x50   :  { %514 = vmatpush3.msra.mxu0 %v268_v38 }
  0x51   :  { %515 = vmatprep.subr.mxu0 %v643_v0 }
  0x52   :  { %516 = vmatpush3.msra.mxu0 %v267_v39 }
  0x53   :  { %517 = vmatprep.subr.mxu0 %v643_v0 }
  0x54   :  { %518 = vmatpush3.msra.mxu0 %v266_v40 }
  0x55   :  { %519 = vmatprep.subr.mxu0 %v643_v0 }
  0x56   :  { %520 = vmatpush3.msra.mxu0 %v265_v41 }
  0x57   :  { %521 = vmatprep.subr.mxu0 %v643_v0 }
  0x58   :  { %522 = vmatpush3.msra.mxu0 %v264_v42 }
  0x59   :  { %523 = vmatprep.subr.mxu0 %v643_v0 }
  0x5a   :  { %524 = vmatpush3.msra.mxu0 %v263_v43 }
  0x5b   :  { %525 = vmatprep.subr.mxu0 %v643_v0 }
  0x5c   :  { %526 = vmatpush3.msra.mxu0 %v262_v44 }
  0x5d   :  { %527 = vmatprep.subr.mxu0 %v643_v0 }
  0x5e   :  { %528 = vmatpush3.msra.mxu0 %v261_v45 }
  0x5f   :  { %529 = vmatprep.subr.mxu0 %v643_v0 }
  0x60   :  { %530 = vmatpush3.msra.mxu0 %v260_v46 }
  0x61   :  { %531 = vmatprep.subr.mxu0 %v643_v0 }
  0x62   :  { %532 = vmatpush3.msra.mxu0 %v259_v52 }
  0x63   :  { %533 = vmatprep.subr.mxu0 %v643_v0 }
  0x64   :  { %534 = vmatpush3.msra.mxu0 %v258_v53 }
  0x65   :  { %535 = vmatprep.subr.mxu0 %v643_v0 }
  0x66   :  { %536 = vmatpush3.msra.mxu0 %v257_v54 }
 0x107   :  { %v158_v48 = vpop.f32.mrf.mxu0 }
 0x108   :  { %v159_v49 = vadd.f32 %v381_v47, %v158_v48 }
 0x109   :  { %v469_v50 = vpop.f32.mrf.mxu0 }
 0x10a   :  { %v162_v51 = vmax.f32 %v159_v49, 0.0 }
 0x10c   :  { %503 = vmatmul.mubr.f32.vlgmr.msra.gmra.mxu1 %v162_v51 }
 0x1cc   :  { %v252_v56 = vpop.f32.mrf.mxu1 }
 0x1cd   :  { %v253_v57 = vadd.f32 %v382_v55, %v252_v56 }
 0x1ce   :  { %v504_v58 = vpop.f32.mrf.mxu1 }
 0x1cf   :  { %v256_v59 = vmax.f32 %v253_v57, 0.0 }
 0x1d1   :  { %538 = vmatmul.mubr.f32.vlgmr.msra.gmra.mxu0 %v256_v59 }
 0x291   :  { %v346_v63 = vpop.f32.mrf.mxu0 }
 0x292   :  { %v347_v0 = vadd.f32 %v383_v62, %v346_v63 }
 0x293   :  { %v539_v1 = vpop.f32.mrf.mxu0 }
 0x294   :  { %v353_v2 = vsel %vm352_vm1, %v347_v0, -1e+30 }
 0x295   :  { %354 = vmax.xlane.f32.xlu0 %v353_v2 }
 0x31e   :  { %v355_v3 = vpop.xlane.xlu0 %354 }
 0x31f   :  { %v356_v4 = vsub.f32 %v353_v2, %v355_v3 }
 0x321   :  { %v357_v5 = vmul.f32 1.442695, %v356_v4 }
 0x323   :  { %548 = vpow2.f32 %v357_v5 }
 0x330   :  { %v549_v6 = vpop.eup %548 }
 0x331   :  { %359 = vadd.xlane.f32.xlu0 %v549_v6 }
 0x3ba   :  { %v360_v7 = vpop.xlane.xlu0 %359 }
 0x3bb   :  { %550 = vlog2.f32 %v360_v7 }
 0x3c8   :  { %v551_v8 = vpop.eup %550 }
 0x3c9   :  { %v362_v9 = vmul.f32 0.6931472, %v551_v8 }
 0x3cb   :  { %v363_v10 = vsub.f32 %v356_v4, %v362_v9 }
 0x3cd   :  { %364 = vst [vmem:[#allocation8] sm:$0xff] %v363_v10 }
 0x3ce   :  { %623 = shalt.err (!%p620_p5)
}
 0x3cf   :  { %374 = dma.vmem_to_hbm [thread:$0]  %s372_s21, 128, %s771_s7, [#allocation4]  }
 0x3d0   :  { %636 = dma.done.wait [#allocation4], 128  }
 0x3d1   :  { %637 = vsyncadd [#allocation4], 4294967168 }
 0x3d2   :  { %378 = vsyncpa [#allocation3], 1 }
 0x3d3   :  { %379 = vsyncpa [#allocation6], 1 }
 0x3d4   :  { %380 = vsyncpa [#allocation4], 1 }

// kernel: forward.1
= control target key start
LH: loop header
LB: loop body
LE: loop exit
PB: predicated region body
PF: predicated region fallthrough
CT: control target
= control target key end

     0   :  { %12 = vsyncpa [#allocation3], 0  ;;  %s764_s0 = inlined_call_operand.vmem [shape: f32[8,128], index: 0, kind: input, shape index: {}]   ;;  %s765_s1 = inlined_call_operand.hbm [shape: f32[128,128], index: 1, kind: input, shape index: {}]   ;;  %s766_s2 = inlined_call_operand.vmem [shape: f32[1,128], index: 2, kind: input, shape index: {}]   ;;  %s767_s3 = inlined_call_operand.hbm [shape: f32[128,128], index: 3, kind: input, shape index: {}]   ;;  %s768_s4 = inlined_call_operand.vmem [shape: f32[1,128], index: 4, kind: input, shape index: {}]   ;;  %s769_s5 = inlined_call_operand.hbm [shape: f32[128,128], index: 5, kind: input, shape index: {}]   ;;  %s770_s6 = inlined_call_operand.vmem [shape: f32[1,128], index: 6, kind: input, shape index: {}]   ;;  %s771_s7 = inlined_call_operand.hbm [shape: f32[8,128], index: 7, kind: output, shape index: {}]  }
   0x1   :  { %13 = vsyncpa [#allocation6], 0 }
   0x2   :  { %14 = vsyncpa [#allocation4], 0  ;;  %s638_s24 = smov [#allocation5]   ;;  %s639_s26 = smov [#allocation2]  }
   0x3   :  { %s36_s25 = sshll.u32 %s638_s24, 4  ;;  %s22_s27 = sshll.u32 %s639_s26, 4  ;;  %s37_s25 = int_to_ptr.vmem [resolvable:$true] %s36_s25  ;;  %s23_s27 = int_to_ptr.vmem [resolvable:$true] %s22_s27 }
   0x4   :  { %s560_s28 = scalar_lea.vmem %s37_s25, 2048  ;;  %p565_p1 = scmp.lt.s32.totalorder %s37_s25, %s37_s25 }
   0x5   :  { %p561_p0 = scmp.ne.s32.totalorder %s37_s25, %s560_s28  ;;  %p566_p2 = scmp.lt.s32.totalorder %s560_s28, %s560_s28 }
   0x7   :  { %p567_p3 = por %p566_p2, %p565_p1 }
   0x9   :  { %p568_p4 = pnand %p567_p3, %p561_p0 }
   0xb   :  { %571 = shalt.err (!%p568_p4)
}
   0xc   :  { %s640_s29 = smov 128   ;;  %s641_s30 = smov 8  }
   0xd   :  { %42 = dma.hbm_to_vmem [thread:$0]  %s767_s3, 2048, %s37_s25, [#allocation6], %s640_s29, %s640_s29, %s641_s30  }
   0xe   :  { %s580_s10 = scalar_lea.vmem %s23_s27, 2048  ;;  %p585_p6 = scmp.lt.s32.totalorder %s23_s27, %s23_s27 }
   0xf   :  { %p581_p5 = scmp.ne.s32.totalorder %s23_s27, %s580_s10  ;;  %p586_p7 = scmp.lt.s32.totalorder %s580_s10, %s580_s10 }
  0x11   :  { %p587_p8 = por %p586_p7, %p585_p6 }
  0x13   :  { %p588_p9 = pnand %p587_p8, %p581_p5 }
  0x15   :  { %591 = shalt.err (!%p588_p9)
}
  0x16   :  { %28 = dma.hbm_to_vmem [thread:$0]  %s765_s1, 2048, %s23_s27, [#allocation3], %s640_s29, %s640_s29, %s641_s30  }
  0x17   :  { %s642_s13 = smov [#allocation7]  }
  0x18   :  { %s50_s14 = sshll.u32 %s642_s13, 4  ;;  %s51_s14 = int_to_ptr.vmem [resolvable:$true] %s50_s14 }
  0x19   :  { %s600_s15 = scalar_lea.vmem %s51_s14, 2048  ;;  %p605_p11 = scmp.lt.s32.totalorder %s51_s14, %s51_s14 }
  0x1a   :  { %p601_p10 = scmp.ne.s32.totalorder %s51_s14, %s600_s15  ;;  %p606_p12 = scmp.lt.s32.totalorder %s600_s15, %s600_s15 }
  0x1c   :  { %p607_p13 = por %p606_p12, %p605_p11 }
  0x1e   :  { %p608_p0 = pnand %p607_p13, %p601_p10 }
  0x20   :  { %611 = shalt.err (!%p608_p0)
}
  0x21   :  { %56 = dma.hbm_to_vmem [thread:$0]  %s769_s5, 2048, %s51_s14, [#allocation6], %s640_s29, %s640_s29, %s641_s30  }
  0x22   :  { %632 = dma.done.wait [#allocation3], 2048  }
  0x23   :  { %633 = vsyncadd [#allocation3], 4294965248 }
  0x24   :  { %634 = dma.done.wait [#allocation6], 4096  }
  0x25   :  { %635 = vsyncadd [#allocation6], 4294963200  ;;  %v643_v0 = vmov 0.0   ;;  %vm644_vm0 = vmmov 0   ;;  %v84_v1 = vld [vmem:[#allocation2 + $0x78] sm:$0xff]  ;;  %v83_v2 = vld [vmem:[#allocation2 + $0x70] sm:$0xff]  ;;  %v350_v60 = vlaneseq }
  0x26   :  { %435 = vmatprep.subr.mxu0 %v643_v0  ;;  %467 = vmatprep.mubr.msk.f32.mxu0 %vm644_vm0, %v643_v0  ;;  %v82_v3 = vld [vmem:[#allocation2 + $0x68] sm:$0xff]  ;;  %v81_v4 = vld [vmem:[#allocation2 + $0x60] sm:$0xff]  ;;  %v178_v5 = vld [vmem:[#allocation5 + $0x78] sm:$0xff] }
  0x27   :  { %470 = vmatprep.subr.mxu1 %v643_v0  ;;  %502 = vmatprep.mubr.msk.f32.mxu1 %vm644_vm0, %v643_v0  ;;  %v80_v6 = vld [vmem:[#allocation2 + $0x58] sm:$0xff]  ;;  %v177_v7 = vld [vmem:[#allocation5 + $0x70] sm:$0xff]  ;;  %v176_v8 = vld [vmem:[#allocation5 + $0x68] sm:$0xff]  ;;  %v351_v61 = vand.u32 127, %v350_v60 }
  0x28   :  { %436 = vmatpush3.msra.mxu0 %v84_v1  ;;  %471 = vmatpush3.msra.mxu1 %v178_v5  ;;  %v79_v9 = vld [vmem:[#allocation2 + $0x50] sm:$0xff]  ;;  %v175_v10 = vld [vmem:[#allocation5 + $0x60] sm:$0xff]  ;;  %v78_v11 = vld [vmem:[#allocation2 + $0x48] sm:$0xff] }
  0x29   :  { %437 = vmatprep.subr.mxu0 %v643_v0  ;;  %472 = vmatprep.subr.mxu1 %v643_v0  ;;  %v174_v12 = vld [vmem:[#allocation5 + $0x58] sm:$0xff]  ;;  %v77_v13 = vld [vmem:[#allocation2 + $0x40] sm:$0xff]  ;;  %v173_v14 = vld [vmem:[#allocation5 + $0x50] sm:$0xff]  ;;  %vm352_vm1 = vcmp.lt.s32.totalorder %v351_v61, 8 }
  0x2a   :  { %438 = vmatpush3.msra.mxu0 %v83_v2  ;;  %473 = vmatpush3.msra.mxu1 %v177_v7  ;;  %v76_v15 = vld [vmem:[#allocation2 + $0x38] sm:$0xff]  ;;  %v172_v16 = vld [vmem:[#allocation5 + $0x48] sm:$0xff]  ;;  %v75_v17 = vld [vmem:[#allocation2 + $0x30] sm:$0xff] }
  0x2b   :  { %439 = vmatprep.subr.mxu0 %v643_v0  ;;  %474 = vmatprep.subr.mxu1 %v643_v0  ;;  %v171_v18 = vld [vmem:[#allocation5 + $0x40] sm:$0xff]  ;;  %v74_v19 = vld [vmem:[#allocation2 + $0x28] sm:$0xff]  ;;  %v170_v20 = vld [vmem:[#allocation5 + $0x38] sm:$0xff] }
  0x2c   :  { %440 = vmatpush3.msra.mxu0 %v82_v3  ;;  %475 = vmatpush3.msra.mxu1 %v176_v8  ;;  %v73_v21 = vld [vmem:[#allocation2 + $0x20] sm:$0xff]  ;;  %v169_v22 = vld [vmem:[#allocation5 + $0x30] sm:$0xff]  ;;  %v72_v23 = vld [vmem:[#allocation2 + $0x18] sm:$0xff] }
  0x2d   :  { %441 = vmatprep.subr.mxu0 %v643_v0  ;;  %476 = vmatprep.subr.mxu1 %v643_v0  ;;  %v168_v24 = vld [vmem:[#allocation5 + $0x28] sm:$0xff]  ;;  %v71_v25 = vld [vmem:[#allocation2 + $0x10] sm:$0xff]  ;;  %v167_v26 = vld [vmem:[#allocation5 + $0x20] sm:$0xff] }
  0x2e   :  { %442 = vmatpush3.msra.mxu0 %v81_v4  ;;  %477 = vmatpush3.msra.mxu1 %v175_v10  ;;  %v70_v27 = vld [vmem:[#allocation2 + $0x8] sm:$0xff]  ;;  %v166_v28 = vld [vmem:[#allocation5 + $0x18] sm:$0xff]  ;;  %v69_v29 = vld [vmem:[#allocation2] sm:$0xff] }
  0x2f   :  { %443 = vmatprep.subr.mxu0 %v643_v0  ;;  %478 = vmatprep.subr.mxu1 %v643_v0  ;;  %v68_v30 = vld [vmem:[%s764_s0] sm:$0xff]  ;;  %v165_v31 = vld [vmem:[#allocation5 + $0x10] sm:$0xff]  ;;  %v164_v32 = vld [vmem:[#allocation5 + $0x8] sm:$0xff] }
  0x30   :  { %444 = vmatpush3.msra.mxu0 %v80_v6  ;;  %479 = vmatpush3.msra.mxu1 %v174_v12  ;;  %v163_v33 = vld [vmem:[#allocation5] sm:$0xff]  ;;  %v272_v34 = vld [vmem:[#allocation7 + $0x78] sm:$0xff]  ;;  %v271_v35 = vld [vmem:[#allocation7 + $0x70] sm:$0xff] }
  0x31   :  { %445 = vmatprep.subr.mxu0 %v643_v0  ;;  %480 = vmatprep.subr.mxu1 %v643_v0  ;;  %v270_v36 = vld [vmem:[#allocation7 + $0x68] sm:$0xff]  ;;  %v269_v37 = vld [vmem:[#allocation7 + $0x60] sm:$0xff]  ;;  %v268_v38 = vld [vmem:[#allocation7 + $0x58] sm:$0xff] }
  0x32   :  { %446 = vmatpush3.msra.mxu0 %v79_v9  ;;  %481 = vmatpush3.msra.mxu1 %v173_v14  ;;  %v267_v39 = vld [vmem:[#allocation7 + $0x50] sm:$0xff]  ;;  %v266_v40 = vld [vmem:[#allocation7 + $0x48] sm:$0xff]  ;;  %v265_v41 = vld [vmem:[#allocation7 + $0x40] sm:$0xff] }
  0x33   :  { %447 = vmatprep.subr.mxu0 %v643_v0  ;;  %482 = vmatprep.subr.mxu1 %v643_v0  ;;  %v264_v42 = vld [vmem:[#allocation7 + $0x38] sm:$0xff]  ;;  %v263_v43 = vld [vmem:[#allocation7 + $0x30] sm:$0xff]  ;;  %v262_v44 = vld [vmem:[#allocation7 + $0x28] sm:$0xff] }
  0x34   :  { %448 = vmatpush3.msra.mxu0 %v78_v11  ;;  %483 = vmatpush3.msra.mxu1 %v172_v16  ;;  %v261_v45 = vld [vmem:[#allocation7 + $0x20] sm:$0xff]  ;;  %v260_v46 = vld [vmem:[#allocation7 + $0x18] sm:$0xff]  ;;  %v259_v52 = vld [vmem:[#allocation7 + $0x10] sm:$0xff] }
  0x35   :  { %449 = vmatprep.subr.mxu0 %v643_v0  ;;  %484 = vmatprep.subr.mxu1 %v643_v0  ;;  %v381_v47 = vld [vmem:[%s766_s2] ss:$0 sm:$0xff]  ;;  %v258_v53 = vld [vmem:[#allocation7 + $0x8] sm:$0xff] }
  0x36   :  { %450 = vmatpush3.msra.mxu0 %v77_v13  ;;  %485 = vmatpush3.msra.mxu1 %v171_v18  ;;  %v257_v54 = vld [vmem:[#allocation7] sm:$0xff] }
  0x37   :  { %451 = vmatprep.subr.mxu0 %v643_v0  ;;  %486 = vmatprep.subr.mxu1 %v643_v0  ;;  %v382_v55 = vld [vmem:[%s768_s4] ss:$0 sm:$0xff]  ;;  %s645_s4 = smov [#allocation8]  }
  0x38   :  { %452 = vmatpush3.msra.mxu0 %v76_v15  ;;  %487 = vmatpush3.msra.mxu1 %v170_v20  ;;  %v383_v62 = vld [vmem:[%s770_s6] ss:$0 sm:$0xff]  ;;  %s371_s21 = sshll.u32 %s645_s4, 4  ;;  %s372_s21 = int_to_ptr.vmem [resolvable:$true] %s371_s21 }
  0x39   :  { %453 = vmatprep.subr.mxu0 %v643_v0  ;;  %488 = vmatprep.subr.mxu1 %v643_v0  ;;  %s612_s6 = scalar_lea.vmem %s372_s21, 128  ;;  %p617_p2 = scmp.lt.s32.totalorder %s372_s21, %s372_s21 }
  0x3a   :  { %454 = vmatpush3.msra.mxu0 %v75_v17  ;;  %489 = vmatpush3.msra.mxu1 %v169_v22  ;;  %p613_p1 = scmp.ne.s32.totalorder %s372_s21, %s612_s6  ;;  %p618_p3 = scmp.lt.s32.totalorder %s612_s6, %s612_s6 }
  0x3b   :  { %455 = vmatprep.subr.mxu0 %v643_v0  ;;  %490 = vmatprep.subr.mxu1 %v643_v0 }
  0x3c   :  { %456 = vmatpush3.msra.mxu0 %v74_v19  ;;  %491 = vmatpush3.msra.mxu1 %v168_v24  ;;  %p619_p4 = por %p618_p3, %p617_p2 }
  0x3d   :  { %457 = vmatprep.subr.mxu0 %v643_v0  ;;  %492 = vmatprep.subr.mxu1 %v643_v0 }
  0x3e   :  { %458 = vmatpush3.msra.mxu0 %v73_v21  ;;  %493 = vmatpush3.msra.mxu1 %v167_v26  ;;  %p620_p5 = pnand %p619_p4, %p613_p1 }
  0x3f   :  { %459 = vmatprep.subr.mxu0 %v643_v0  ;;  %494 = vmatprep.subr.mxu1 %v643_v0 }
  0x40   :  { %460 = vmatpush3.msra.mxu0 %v72_v23  ;;  %495 = vmatpush3.msra.mxu1 %v166_v28 }
  0x41   :  { %461 = vmatprep.subr.mxu0 %v643_v0  ;;  %496 = vmatprep.subr.mxu1 %v643_v0 }
  0x42   :  { %462 = vmatpush3.msra.mxu0 %v71_v25  ;;  %497 = vmatpush3.msra.mxu1 %v165_v31 }
  0x43   :  { %463 = vmatprep.subr.mxu0 %v643_v0  ;;  %498 = vmatprep.subr.mxu1 %v643_v0 }
  0x44   :  { %464 = vmatpush3.msra.mxu0 %v70_v27  ;;  %499 = vmatpush3.msra.mxu1 %v164_v32 }
  0x45   :  { %465 = vmatprep.subr.mxu0 %v643_v0  ;;  %500 = vmatprep.subr.mxu1 %v643_v0 }
  0x46   :  { %466 = vmatpush3.msra.mxu0 %v69_v29  ;;  %501 = vmatpush3.msra.mxu1 %v163_v33 }
  0x47   :  { %468 = vmatmul.mubr.f32.vlgmr.msra.gmra.mxu0 %v68_v30  ;;  %505 = vmatprep.subr.mxu0 %v643_v0 }
  0x48   :  { %537 = vmatprep.mubr.msk.f32.mxu0 %vm644_vm0, %v643_v0  ;;  %506 = vmatpush3.msra.mxu0 %v272_v34 }
  0x49   :  { %507 = vmatprep.subr.mxu0 %v643_v0 }
  0x4a   :  { %508 = vmatpush3.msra.mxu0 %v271_v35 }
  0x4b   :  { %509 = vmatprep.subr.mxu0 %v643_v0 }
  0x4c   :  { %510 = vmatpush3.msra.mxu0 %v270_v36 }
  0x4d   :  { %511 = vmatprep.subr.mxu0 %v643_v0 }
  0x4e   :  { %512 = vmatpush3.msra.mxu0 %v269_v37 }
  0x4f   :  { %513 = vmatprep.subr.mxu0 %v643_v0 }
  0x50   :  { %514 = vmatpush3.msra.mxu0 %v268_v38 }
  0x51   :  { %515 = vmatprep.subr.mxu0 %v643_v0 }
  0x52   :  { %516 = vmatpush3.msra.mxu0 %v267_v39 }
  0x53   :  { %517 = vmatprep.subr.mxu0 %v643_v0 }
  0x54   :  { %518 = vmatpush3.msra.mxu0 %v266_v40 }
  0x55   :  { %519 = vmatprep.subr.mxu0 %v643_v0 }
  0x56   :  { %520 = vmatpush3.msra.mxu0 %v265_v41 }
  0x57   :  { %521 = vmatprep.subr.mxu0 %v643_v0 }
  0x58   :  { %522 = vmatpush3.msra.mxu0 %v264_v42 }
  0x59   :  { %523 = vmatprep.subr.mxu0 %v643_v0 }
  0x5a   :  { %524 = vmatpush3.msra.mxu0 %v263_v43 }
  0x5b   :  { %525 = vmatprep.subr.mxu0 %v643_v0 }
  0x5c   :  { %526 = vmatpush3.msra.mxu0 %v262_v44 }
  0x5d   :  { %527 = vmatprep.subr.mxu0 %v643_v0 }
  0x5e   :  { %528 = vmatpush3.msra.mxu0 %v261_v45 }
  0x5f   :  { %529 = vmatprep.subr.mxu0 %v643_v0 }
  0x60   :  { %530 = vmatpush3.msra.mxu0 %v260_v46 }
  0x61   :  { %531 = vmatprep.subr.mxu0 %v643_v0 }
  0x62   :  { %532 = vmatpush3.msra.mxu0 %v259_v52 }
  0x63   :  { %533 = vmatprep.subr.mxu0 %v643_v0 }
  0x64   :  { %534 = vmatpush3.msra.mxu0 %v258_v53 }
  0x65   :  { %535 = vmatprep.subr.mxu0 %v643_v0 }
  0x66   :  { %536 = vmatpush3.msra.mxu0 %v257_v54 }
 0x107   :  { %v158_v48 = vpop.f32.mrf.mxu0 }
 0x108   :  { %v159_v49 = vadd.f32 %v381_v47, %v158_v48 }
 0x109   :  { %v469_v50 = vpop.f32.mrf.mxu0 }
 0x10a   :  { %v162_v51 = vmax.f32 %v159_v49, 0.0 }
 0x10c   :  { %503 = vmatmul.mubr.f32.vlgmr.msra.gmra.mxu1 %v162_v51 }
 0x1cc   :  { %v252_v56 = vpop.f32.mrf.mxu1 }
 0x1cd   :  { %v253_v57 = vadd.f32 %v382_v55, %v252_v56 }
 0x1ce   :  { %v504_v58 = vpop.f32.mrf.mxu1 }
 0x1cf   :  { %v256_v59 = vmax.f32 %v253_v57, 0.0 }
 0x1d1   :  { %538 = vmatmul.mubr.f32.vlgmr.msra.gmra.mxu0 %v256_v59 }
 0x291   :  { %v346_v63 = vpop.f32.mrf.mxu0 }
 0x292   :  { %v347_v0 = vadd.f32 %v383_v62, %v346_v63 }
 0x293   :  { %v539_v1 = vpop.f32.mrf.mxu0 }
 0x294   :  { %v353_v2 = vsel %vm352_vm1, %v347_v0, -1e+30 }
 0x295   :  { %354 = vmax.xlane.f32.xlu0 %v353_v2 }
 0x31e   :  { %v355_v3 = vpop.xlane.xlu0 %354 }
 0x31f   :  { %v356_v4 = vsub.f32 %v353_v2, %v355_v3 }
 0x321   :  { %v357_v5 = vmul.f32 1.442695, %v356_v4 }
 0x323   :  { %548 = vpow2.f32 %v357_v5 }
 0x330   :  { %v549_v6 = vpop.eup %548 }
 0x331   :  { %359 = vadd.xlane.f32.xlu0 %v549_v6 }
 0x3ba   :  { %v360_v7 = vpop.xlane.xlu0 %359 }
 0x3bb   :  { %550 = vlog2.f32 %v360_v7 }
 0x3c8   :  { %v551_v8 = vpop.eup %550 }
 0x3c9   :  { %v362_v9 = vmul.f32 0.6931472, %v551_v8 }
 0x3cb   :  { %v363_v10 = vsub.f32 %v356_v4, %v362_v9 }
 0x3cd   :  { %364 = vst [vmem:[#allocation8] sm:$0xff] %v363_v10 }
 0x3ce   :  { %623 = shalt.err (!%p620_p5)
}
 0x3cf   :  { %374 = dma.vmem_to_hbm [thread:$0]  %s372_s21, 128, %s771_s7, [#allocation4]  }
 0x3d0   :  { %636 = dma.done.wait [#allocation4], 128  }
 0x3d1   :  { %637 = vsyncadd [#allocation4], 4294967168 }
 0x3d2   :  { %378 = vsyncpa [#allocation3], 1 }
 0x3d3   :  { %379 = vsyncpa [#allocation6], 1 }
 0x3d4   :  { %380 = vsyncpa [#allocation4], 1 }

</bundles_post_ra>
